<compile_context>
chip_gen: v7x
topology: tpu7x:2x2x1
jax: 0.10.0
libtpu: 0.0.40
codegen_flags: <defaults>
</compile_context>

<pallas_src>
import jax
import jax.numpy as jnp
from jax import lax
from jax.experimental import pallas as pl
from jax.experimental.pallas import tpu as pltpu

EPS = 1e-12  # F.normalize default eps
VMEM_LIMIT_BYTES = 48 * 1024 * 1024  # safe on v5e/v6e (128 MiB) and v7x (64 MiB)


def _round_up(x, m):
    return (x + m - 1) // m * m


def _maybe_pad2d(a, rows, cols, dtype):
    """Cast; only materialize a padded copy when the shape actually changes."""
    a = a.astype(dtype)
    r, c = a.shape
    if r == rows and c == cols:
        return a
    return jnp.zeros((rows, cols), dtype).at[:r, :c].set(a)


# --------------------------------------------------------------------------
# Kernel 1: backbone matmul (K-accumulated into f32 feat output) + normalize.
# --------------------------------------------------------------------------
def feat_norm_kernel(x_ref, wb_ref, bb_ref, feat_ref, nf_ref):
    k = pl.program_id(1)

    @pl.when(k == 0)
    def _():
        feat_ref[...] = jnp.zeros_like(feat_ref)

    # Partial matmul over this K tile, accumulated in the f32 feat block
    # (out_spec index (i, 0) is constant over k, so the block stays in VMEM).
    feat_ref[...] += jnp.dot(
        x_ref[...], wb_ref[...], preferred_element_type=jnp.float32
    )

    @pl.when(k == pl.num_programs(1) - 1)
    def _():
        feat = feat_ref[...] + bb_ref[...].astype(jnp.float32)
        feat_ref[...] = feat

        # F.normalize(feat): 1/max(||feat||, eps) == rsqrt(max(sum_sq, eps^2))
        sum_sq = jnp.sum(feat * feat, axis=-1, keepdims=True)
        inv = lax.rsqrt(jnp.maximum(sum_sq, EPS * EPS))
        nf_ref[...] = (feat * inv).astype(nf_ref.dtype)


# --------------------------------------------------------------------------
# Kernel 2: cos = norm_feat @ wn_T, tiled over (rows, classes). wn_T is the
# pre-normalized, pre-transposed class weight matrix (dp, ncp).
# --------------------------------------------------------------------------
def cos_kernel(nf_ref, wnt_ref, cos_ref):
    cos_ref[...] = jnp.dot(
        nf_ref[...], wnt_ref[...], preferred_element_type=jnp.float32
    ).astype(cos_ref.dtype)


def cos_model_forward(x_nchw, w_backbone, b_backbone, my_weights, *,
                      use_bf16=True, tm=None, tk=512, tn=512):
    """Runs CosModel.forward. Returns (feat, cos)."""
    n = x_nchw.shape[0]
    x_flat = x_nchw.reshape(n, -1).astype(jnp.float32)   # glue: NCHW flatten
    k_dim = x_flat.shape[1]
    d = w_backbone.shape[1]
    n_classes = my_weights.shape[0]

    # Loop-invariant: pre-normalize AND pre-transpose class weights once (f32).
    w32 = my_weights.astype(jnp.float32)
    wn = w32 * lax.rsqrt(
        jnp.maximum(jnp.sum(w32 * w32, axis=-1, keepdims=True), EPS * EPS)
    )
    wn_t = wn.T                                            # (d, n_classes)

    in_dtype = jnp.bfloat16 if use_bf16 else jnp.float32
    itemsize = 2 if use_bf16 else 4
    sublane = 16 if use_bf16 else 8                        # packed bf16 sublanes

    # Lane-dense padded shapes (last dims multiples of 128).
    dp = _round_up(d, 128)
    ncp = _round_up(n_classes, 128)
    if tm is None:
        tm = min(256, _round_up(n, sublane))
    np_ = _round_up(n, tm)
    tk = min(tk, _round_up(k_dim, 128))
    kp = _round_up(k_dim, tk)
    tn = min(tn, ncp)
    ncp = _round_up(ncp, tn)

    x_p = _maybe_pad2d(x_flat, np_, kp, in_dtype)
    wb_p = _maybe_pad2d(w_backbone, kp, dp, in_dtype)
    bb_p = _maybe_pad2d(b_backbone.reshape(1, d), 1, dp, jnp.float32)
    wnt_p = _maybe_pad2d(wn_t, dp, ncp, in_dtype)

    cparams = pltpu.CompilerParams(
        dimension_semantics=("parallel", "arbitrary"),
        vmem_limit_bytes=VMEM_LIMIT_BYTES,
    )

    # ---- call 1: feat + norm_feat -------------------------------------
    row_tiles = np_ // tm
    ce1 = pl.CostEstimate(
        flops=int(2 * np_ * kp * dp),
        transcendentals=int(np_),
        bytes_accessed=int(
            np_ * kp * itemsize
            + row_tiles * kp * dp * itemsize
            + dp * 4
            + np_ * dp * 4
            + np_ * dp * itemsize
        ),
    )
    feat_p, nf_p = pl.pallas_call(
        feat_norm_kernel,
        out_shape=(
            jax.ShapeDtypeStruct((np_, dp), jnp.float32),
            jax.ShapeDtypeStruct((np_, dp), in_dtype),
        ),
        grid_spec=pltpu.PrefetchScalarGridSpec(
            num_scalar_prefetch=0,
            grid=(row_tiles, kp // tk),
            in_specs=[
                pl.BlockSpec((tm, tk), lambda i, k: (i, k)),   # x tile
                pl.BlockSpec((tk, dp), lambda i, k: (k, 0)),   # Wb tile
                pl.BlockSpec((1, dp), lambda i, k: (0, 0)),    # bias
            ],
            out_specs=(
                pl.BlockSpec((tm, dp), lambda i, k: (i, 0)),   # feat (f32 acc)
                pl.BlockSpec((tm, dp), lambda i, k: (i, 0)),   # norm_feat
            ),
        ),
        compiler_params=cparams,
        cost_estimate=ce1,
    )(x_p, wb_p, bb_p)

    # ---- call 2: cos = norm_feat @ wn_T, class dim tiled ---------------
    cparams2 = pltpu.CompilerParams(
        dimension_semantics=("parallel", "parallel"),
        vmem_limit_bytes=VMEM_LIMIT_BYTES,
    )
    ce2 = pl.CostEstimate(
        flops=int(2 * np_ * dp * ncp),
        transcendentals=0,
        bytes_accessed=int(
            np_ * dp * itemsize
            + row_tiles * dp * ncp * itemsize
            + np_ * ncp * 4
        ),
    )
    cos_p = pl.pallas_call(
        cos_kernel,
        out_shape=jax.ShapeDtypeStruct((np_, ncp), jnp.float32),
        grid_spec=pltpu.PrefetchScalarGridSpec(
            num_scalar_prefetch=0,
            grid=(row_tiles, ncp // tn),
            in_specs=[
                pl.BlockSpec((tm, dp), lambda i, j: (i, 0)),   # norm_feat rows
                pl.BlockSpec((dp, tn), lambda i, j: (0, j)),   # wn_T class tile
            ],
            out_specs=pl.BlockSpec((tm, tn), lambda i, j: (i, j)),
        ),
        compiler_params=cparams2,
        cost_estimate=ce2,
    )(nf_p, wnt_p)

    # Slice padding off in plain JAX.
    return feat_p[:n, :d], cos_p[:n, :n_classes]


def reference_forward(x_nchw, w_backbone, b_backbone, my_weights):
    n = x_nchw.shape[0]
    x_flat = x_nchw.reshape(n, -1).astype(jnp.float32)
    feat = x_flat @ w_backbone + b_backbone
    nf = feat / jnp.maximum(
        jnp.sqrt(jnp.sum(feat * feat, axis=-1, keepdims=True)), EPS
    )
    nw = my_weights / jnp.maximum(
        jnp.sqrt(jnp.sum(my_weights * my_weights, axis=-1, keepdims=True)), EPS
    )
    return feat, nf @ nw.T


if __name__ == "__main__":
    # Small, deterministic config (K = 768 -> 2 K-tiles at tk=512, exercises
    # the K-accumulation path; class/feature dims padded to 128).
    N, C, H, W = 4, 3, 16, 16
    OUTPUT_DIM = 32
    N_CLASSES = 16

    key = jax.random.PRNGKey(0)
    k_x, k_wb, k_bb, k_w = jax.random.split(key, 4)

    x = jax.random.normal(k_x, (N, C, H, W), dtype=jnp.float32)

    in_dim = C * H * W
    w_backbone = (
        jax.random.normal(k_wb, (in_dim, OUTPUT_DIM), dtype=jnp.float32)
        * (1.0 / jnp.sqrt(in_dim))
    )
    b_backbone = jax.random.normal(k_bb, (1, OUTPUT_DIM), dtype=jnp.float32) * 0.01

    # my_weights = torch.rand(n_classes, output_dim) -> uniform [0, 1)
    my_weights = jax.random.uniform(k_w, (N_CLASSES, OUTPUT_DIM), dtype=jnp.float32)

    feat_ref, cos_ref = reference_forward(x, w_backbone, b_backbone, my_weights)

    # f32 path: exact PyTorch semantics.
    feat, cos = cos_model_forward(
        x, w_backbone, b_backbone, my_weights, use_bf16=False
    )
    jax.block_until_ready((feat, cos))
    assert feat.shape == (N, OUTPUT_DIM) and cos.shape == (N, N_CLASSES)
    assert jnp.allclose(feat, feat_ref, atol=1e-4, rtol=1e-4)
    assert jnp.allclose(cos, cos_ref, atol=1e-4, rtol=1e-4)

    # bf16 MXU path (default; f32 accumulation + f32 normalize math).
    feat_bf, cos_bf = cos_model_forward(x, w_backbone, b_backbone, my_weights)
    jax.block_until_ready((feat_bf, cos_bf))
    assert feat_bf.shape == (N, OUTPUT_DIM) and cos_bf.shape == (N, N_CLASSES)
    assert jnp.allclose(feat_bf, feat_ref, atol=5e-2, rtol=5e-2)
    assert jnp.allclose(cos_bf, cos_ref, atol=5e-2, rtol=5e-2)

    print("KERNEL_OK")
</pallas_src>

<mosaic_0001>
module attributes {stable_mosaic.version = 11 : i64} {
  func.func @feat_norm_kernel(%arg0: i32, %arg1: i32, %arg2: memref<8x512xf32, #tpu.memory_space<vmem>>, %arg3: memref<512x128xf32, #tpu.memory_space<vmem>>, %arg4: memref<1x128xf32, #tpu.memory_space<vmem>>, %arg5: memref<8x128xf32, #tpu.memory_space<vmem>>, %arg6: memref<8x128xf32, #tpu.memory_space<vmem>>) attributes {dimension_semantics = [#tpu.dimension_semantics<parallel>, #tpu.dimension_semantics<arbitrary>], iteration_bounds = array<i64: 1, 2>, scalar_prefetch = 0 : i64, scratch_operands = 0 : i64, tpu.core_type = #tpu.core_type<tc>, window_params = [{transform_indices = @transform_0, window_bounds = array<i64: 8, 512>}, {transform_indices = @transform_1, window_bounds = array<i64: 512, 128>}, {pipeline_mode = #tpu.pipeline_mode<synchronous>, transform_indices = @transform_2, window_bounds = array<i64: 1, 128>}, {transform_indices = @transform_3, window_bounds = array<i64: 8, 128>}, {transform_indices = @transform_4, window_bounds = array<i64: 8, 128>}]} {
    %c0_i32 = arith.constant 0 : i32
    %0 = arith.cmpi eq, %arg1, %c0_i32 : i32
    %1 = arith.extui %0 : i1 to i32
    %c0_i32_0 = arith.constant 0 : i32
    %2 = arith.cmpi ne, %1, %c0_i32_0 : i32
    scf.if %2 {
      %cst_9 = arith.constant 0.000000e+00 : f32
      %12 = vector.broadcast %cst_9 : f32 to vector<8x128xf32>
      %c0_10 = arith.constant 0 : index
      %c0_11 = arith.constant 0 : index
      %13 = vector.load %arg5[%c0_10, %c0_11] : memref<8x128xf32, #tpu.memory_space<vmem>>, vector<8x128xf32>
      tpu.vector_store %arg5[%c0_10, %c0_11], %12 {strides = array<i32>} : memref<8x128xf32, #tpu.memory_space<vmem>>, vector<8x128xf32>,
    } else {
    }
    %c0 = arith.constant 0 : index
    %c0_1 = arith.constant 0 : index
    %3 = vector.load %arg5[%c0, %c0_1] : memref<8x128xf32, #tpu.memory_space<vmem>>, vector<8x128xf32>
    %c0_2 = arith.constant 0 : index
    %c0_3 = arith.constant 0 : index
    %4 = vector.load %arg2[%c0_2, %c0_3] : memref<8x512xf32, #tpu.memory_space<vmem>>, vector<8x512xf32>
    %c0_4 = arith.constant 0 : index
    %c0_5 = arith.constant 0 : index
    %5 = vector.load %arg3[%c0_4, %c0_5] : memref<512x128xf32, #tpu.memory_space<vmem>>, vector<512x128xf32>
    %cst = arith.constant dense<0.000000e+00> : vector<8x128xf32>
    %6 = tpu.matmul %4, %5, %cst {dimension_numbers = #tpu.dot_dimension_numbers<[1], [0], [0], [1], [0, 0, 1, 1], [], []>} : vector<8x512xf32>, vector<512x128xf32>, vector<8x128xf32> -> vector<8x128xf32>
    %7 = arith.addf %3, %6 : vector<8x128xf32>
    %c0_6 = arith.constant 0 : index
    %c0_7 = arith.constant 0 : index
    %8 = vector.load %arg5[%c0_6, %c0_7] : memref<8x128xf32, #tpu.memory_space<vmem>>, vector<8x128xf32>
    tpu.vector_store %arg5[%c0_6, %c0_7], %7 {strides = array<i32>} : memref<8x128xf32, #tpu.memory_space<vmem>>, vector<8x128xf32>,
    %c1_i32 = arith.constant 1 : i32
    %9 = arith.cmpi eq, %arg1, %c1_i32 : i32
    %10 = arith.extui %9 : i1 to i32
    %c0_i32_8 = arith.constant 0 : i32
    %11 = arith.cmpi ne, %10, %c0_i32_8 : i32
    scf.if %11 {
      %c0_9 = arith.constant 0 : index
      %c0_10 = arith.constant 0 : index
      %12 = vector.load %arg5[%c0_9, %c0_10] : memref<8x128xf32, #tpu.memory_space<vmem>>, vector<8x128xf32>
      %c0_11 = arith.constant 0 : index
      %c0_12 = arith.constant 0 : index
      %13 = vector.load %arg4[%c0_11, %c0_12] : memref<1x128xf32, #tpu.memory_space<vmem>>, vector<1x128xf32>
      %14 = vector.broadcast %13 : vector<1x128xf32> to vector<8x128xf32>
      %15 = arith.addf %12, %14 : vector<8x128xf32>
      %c0_13 = arith.constant 0 : index
      %c0_14 = arith.constant 0 : index
      %16 = vector.load %arg5[%c0_13, %c0_14] : memref<8x128xf32, #tpu.memory_space<vmem>>, vector<8x128xf32>
      tpu.vector_store %arg5[%c0_13, %c0_14], %15 {strides = array<i32>} : memref<8x128xf32, #tpu.memory_space<vmem>>, vector<8x128xf32>,
      %17 = arith.mulf %15, %15 : vector<8x128xf32>
      %cst_15 = arith.constant dense<0.000000e+00> : vector<8xf32>
      %18 = vector.multi_reduction <add>, %17, %cst_15 [1] : vector<8x128xf32> to vector<8xf32>
      %19 = vector.shape_cast %18 : vector<8xf32> to vector<8x1xf32>
      %cst_16 = arith.constant 1.000000e-24 : f32
      %20 = vector.broadcast %cst_16 : f32 to vector<8x1xf32>
      %21 = arith.maximumf %19, %20 : vector<8x1xf32>
      %22 = math.rsqrt %21 : vector<8x1xf32>
      %23 = vector.broadcast %22 : vector<8x1xf32> to vector<8x128xf32>
      %24 = arith.mulf %15, %23 : vector<8x128xf32>
      %c0_17 = arith.constant 0 : index
      %c0_18 = arith.constant 0 : index
      %25 = vector.load %arg6[%c0_17, %c0_18] : memref<8x128xf32, #tpu.memory_space<vmem>>, vector<8x128xf32>
      tpu.vector_store %arg6[%c0_17, %c0_18], %24 {strides = array<i32>} : memref<8x128xf32, #tpu.memory_space<vmem>>, vector<8x128xf32>,
    } else {
    }
    return
  }
  func.func @transform_0(%arg0: i32, %arg1: i32) -> (i32, i32) {
    %c0_i32 = arith.constant 0 : i32
    return %arg0, %arg1 : i32, i32
  }
  func.func @transform_1(%arg0: i32, %arg1: i32) -> (i32, i32) {
    %c0_i32 = arith.constant 0 : i32
    %c0_i32_0 = arith.constant 0 : i32
    return %arg1, %c0_i32 : i32, i32
  }
  func.func @transform_2(%arg0: i32, %arg1: i32) -> (i32, i32) {
    %c0_i32 = arith.constant 0 : i32
    %c0_i32_0 = arith.constant 0 : i32
    %c0_i32_1 = arith.constant 0 : i32
    return %c0_i32, %c0_i32_0 : i32, i32
  }
  func.func @transform_3(%arg0: i32, %arg1: i32) -> (i32, i32) {
    %c0_i32 = arith.constant 0 : i32
    %c0_i32_0 = arith.constant 0 : i32
    return %arg0, %c0_i32 : i32, i32
  }
  func.func @transform_4(%arg0: i32, %arg1: i32) -> (i32, i32) {
    %c0_i32 = arith.constant 0 : i32
    %c0_i32_0 = arith.constant 0 : i32
    return %arg0, %c0_i32 : i32, i32
  }
}

</mosaic_0001>

<bundles_post_ra>
// kernel: tpu_custom_call.1
= control target key start
LH: loop header
LB: loop body
LE: loop exit
PB: predicated region body
PF: predicated region fallthrough
CT: control target
= control target key end

     0   :  { %10 = vsyncpa [#allocation3], 0  ;;  %s1377_s0 = inlined_call_operand.hbm [shape: f32[8,1024], index: 0, kind: input, shape index: {}]   ;;  %s1378_s1 = inlined_call_operand.hbm [shape: f32[1024,128], index: 1, kind: input, shape index: {}]   ;;  %s1379_s2 = inlined_call_operand.vmem [shape: f32[1,128], index: 2, kind: input, shape index: {}]   ;;  %s1380_s3 = inlined_call_operand.hbm [shape: f32[8,128], index: 3, kind: output, shape index: {0}]   ;;  %s1381_s4 = inlined_call_operand.hbm [shape: f32[8,128], index: 4, kind: output, shape index: {1}]  }
   0x1   :  { %12 = vsyncpa [#allocation3 + $0x1], 0 }
   0x2   :  { %13 = vsyncpa [#allocation6], 0 }
   0x3   :  { %15 = vsyncpa [#allocation6 + $0x1], 0 }
   0x4   :  { %16 = vsyncpa [#allocation4], 0 }
   0x5   :  { %17 = vsyncpa [#allocation9], 0  ;;  %s1072_s15 = smov 0   ;;  %s1074_s16 = smov 0  }
   0x6   :  { %s1076_s17 = smov 0   ;;  %s1078_s18 = smov 0  }
   0x7   :  { %s1080_s19 = smov 0   ;;  %s1082_s20 = smov 0  }
   0x8 LB: > { %s628_s21 = sadd.s32 4294967295, %s1038_s20   ;;  %s32_s22 = sadd.s32 1, %s1034_s19  ;;  %s1038_s20 = sphi %s1082_s20, %s23_s20   ;;  %s1034_s19 = sphi %s1080_s19, %s1395_s19   ;;  %s1030_s18 = sphi %s1078_s18, %s1394_s18   ;;  %s1026_s17 = sphi %s1076_s17, %s1393_s17   ;;  %s1022_s16 = sphi %s1074_s16, %s1392_s16   ;;  %s1018_s15 = sphi %s1072_s15, %s1391_s15  }
   0x9   : > { %p33_p0 = scmp.ge.s32.totalorder %s32_s22, 2  ;;  %s44_s23 = sadd.s32 1, %s1026_s17 }
   0xa   : > { %p51_p1 = scmp.ne.s32.totalorder %s1026_s17, %s1022_s16  ;;  %p52_p2 = scmp.eq.s32.totalorder %s1038_s20, 0 }
   0xb   : > { %s1397_s22 = smov (%p33_p0, %s32_s22), 0  ;;  %p57_p4 = scmp.ne.s32.totalorder %s1022_s16, %s1018_s15 }
   0xc   : > { %p1108_p3 = por %p52_p2, %p51_p1  ;;  %s40_s25 = ssub.s32 %s1034_s19, %s1397_s22 }
   0xd   : > { %p58_p5 = scmp.eq.s32.totalorder %s628_s21, 0  ;;  %p42_p6 = scmp.eq.s32.totalorder %s40_s25, 0 }
   0xe   : > { %p804_p8 = scmp.lt.s32.totalorder %s1038_s20, 2  ;;  %s1126_s28 = sand.u32 1, %s1026_s17  }
   0xf   : > { %p1117_p7 = por %p58_p5, %p57_p4  ;;  %s649_s29 = sshll.u32 %s1034_s19, 9 }
  0x10   : > { %s1123_s27 = scalar_select %p42_p6, %s1026_s17, %s44_s23  }
  0x11   : > { %s1384_s26 = scalar_select %p1117_p7, 1, 0 }
  0x12   : > { %s631_s30 = sshll.u32 %s1126_s28, 5  ;;  %s1133_s7 = scalar_lea.hbm %s1377_s0, %s649_s29 }
  0x13   : > { %s187_s8 = scalar_lea.vmem [#allocation2], %s631_s30  ;;  %p1137_p9 = pnand %p804_p8, %p1108_p3 }
  0x14   : > { %s197_s9 = sshll.u32 %s187_s8, 4  ;;  %s184_s11 = scalar_lea.sflag [#allocation3], %s1126_s28  ;;  %s1141_s9 = int_to_ptr.vmem [resolvable:$true] %s197_s9 }
  0x15   : > { %s864_s12 = scalar_lea.hbm %s1133_s7, 512  ;;  %p866_p13 = pneg %p1137_p9 }
  0x16   : > { %p865_p12 = scmp.ne.s32.totalorder %s1133_s7, %s864_s12  ;;  %s869_s15 = scalar_lea.hbm %s1377_s0, 1024 }
  0x17   : > { %p870_p2 = scmp.lt.u32.totalorder %s1133_s7, %s1377_s0  ;;  %p871_p3 = scmp.lt.u32.totalorder %s869_s15, %s864_s12 }
  0x18   : > { %p867_p0 = pnand %p866_p13, %p865_p12  ;;  %p873_p5 = scmp.lt.u32.totalorder %s864_s12, %s1133_s7 }
  0x19   : > { %p872_p4 = por %p871_p3, %p870_p2 }
  0x1a   : > { %p868_p1 = pneg %p867_p0 }
  0x1b   : > { %p874_p6 = por %p873_p5, %p872_p4 }
  0x1d   : > { %p875_p8 = pnand %p874_p6, %p868_p1 }
  0x1f   : > { %878 = shalt.err (!%p875_p8)
}
  0x20   : > { %s879_s25 = scalar_lea.vmem %s1141_s9, 512  ;;  %s1040_s29 = smov [#allocation2]  }
  0x21   : > { %p880_p12 = scmp.ne.s32.totalorder %s1141_s9, %s879_s25  ;;  %s884_s30 = sshll.u32 %s1040_s29, 4  ;;  %s885_s30 = int_to_ptr.vmem [resolvable:$false] %s884_s30 }
  0x22   : > { %s886_s5 = scalar_lea.vmem %s885_s30, 1024  ;;  %p887_p11 = scmp.lt.s32.totalorder %s1141_s9, %s885_s30 }
  0x23   : > { %p882_p0 = pnand %p880_p12, %p866_p13  ;;  %p888_p2 = scmp.lt.s32.totalorder %s886_s5, %s879_s25 }
  0x25   : > { %p883_p10 = pneg %p882_p0  ;;  %p889_p3 = por %p888_p2, %p887_p11 }
  0x27   : > { %p890_p4 = pnand %p889_p3, %p883_p10 }
  0x29   : > { %893 = shalt.err (!%p890_p4)
}
  0x2a   : > { %800 = dma.hbm_to_vmem [thread:$0]  (!%p1137_p9), %s1133_s7, 512, %s1141_s9, %s184_s11  }
  0x2b   : > { %p1386_p1 = scmp.lt.s32.totalorder %s1038_s20, 3  ;;  %p1387_p5 = scmp.ge.s32.totalorder %s1038_s20, 1 }
  0x2c   : > { %s634_s8 = sshll.u32 %s1126_s28, 9  ;;  %s650_s12 = sshll.u32 %s1034_s19, 13 }
  0x2d   : > { %p1175_p6 = pnand %p1387_p5, %p1386_p1  ;;  %s1184_s15 = scalar_lea.hbm %s1378_s1, %s650_s12 }
  0x2e   : > { %s208_s23 = scalar_lea.vmem [#allocation5], %s634_s8  ;;  %s205_s7 = scalar_lea.sflag [#allocation6], %s1126_s28 }
  0x2f   : > { %s215_s24 = sshll.u32 %s208_s23, 4  ;;  %s894_s9 = scalar_lea.hbm %s1184_s15, 8192  ;;  %s1186_s24 = int_to_ptr.vmem [resolvable:$true] %s215_s24 }
  0x30   : > { %p895_p10 = scmp.ne.s32.totalorder %s1184_s15, %s894_s9  ;;  %s899_s29 = scalar_lea.hbm %s1378_s1, 16384 }
  0x31   : > { %p900_p12 = scmp.lt.u32.totalorder %s1184_s15, %s1378_s1  ;;  %p901_p0 = scmp.lt.u32.totalorder %s899_s29, %s894_s9 }
  0x32   : > { %p897_p11 = pnand %p895_p10, %p866_p13  ;;  %p903_p3 = scmp.lt.u32.totalorder %s894_s9, %s1184_s15 }
  0x33   : > { %p902_p2 = por %p901_p0, %p900_p12 }
  0x34   : > { %p898_p8 = pneg %p897_p11 }
  0x35   : > { %p904_p4 = por %p903_p3, %p902_p2 }
  0x37   : > { %p905_p1 = pnand %p904_p4, %p898_p8 }
  0x39   : > { %908 = shalt.err (!%p905_p1)
}
  0x3a   : > { %s909_s8 = scalar_lea.vmem %s1186_s24, 8192  ;;  %s1041_s12 = smov [#allocation5]  }
  0x3b   : > { %p910_p5 = scmp.ne.s32.totalorder %s1186_s24, %s909_s8  ;;  %s914_s13 = sshll.u32 %s1041_s12, 4  ;;  %s915_s13 = int_to_ptr.vmem [resolvable:$false] %s914_s13 }
  0x3c   : > { %s916_s14 = scalar_lea.vmem %s915_s13, 16384  ;;  %p917_p7 = scmp.lt.s32.totalorder %s1186_s24, %s915_s13 }
  0x3d   : > { %p912_p10 = pnand %p910_p5, %p866_p13  ;;  %p918_p12 = scmp.lt.s32.totalorder %s916_s14, %s909_s8 }
  0x3f   : > { %p913_p11 = pneg %p912_p10  ;;  %p919_p0 = por %p918_p12, %p917_p7 }
  0x41   : > { %p920_p2 = pnand %p919_p0, %p913_p11 }
  0x43   : > { %923 = shalt.err (!%p920_p2)
}
  0x44   : > { %s1042_s23 = smov 128   ;;  %s1043_s9 = smov 8  }
  0x45   : > { %803 = dma.hbm_to_vmem [thread:$0]  (!%p1137_p9), %s1184_s15, 8192, %s1186_s24, %s205_s7, %s1042_s23, %s1042_s23, %s1043_s9  }
  0x46   : > { %227 = sbr.rel (%p1175_p6) target bundleno = 564 (0x234), region = 32  ;;  %s229_s11 = sand.u32 (!%p1175_p6), 1, %s1022_s16  }
  0x47   : > { %s638_s25 = sshll.u32 (!%p1175_p6), %s229_s11, 5  ;;  %s230_s29 = scalar_lea.sflag (!%p1175_p6), [#allocation3], %s229_s11 }
  0x48   : > { %s1217_s30 = scalar_lea.vmem (!%p1175_p6), [#allocation2], %s638_s25  ;;  %p1389_p7 = scmp.ne.s32.totalorder (!%p1175_p6), %s1384_s26, 0 }
  0x4d   : > { %1001 = dma.done.wait (%p1389_p7), %s230_s29, 512  }
  0x4e   : > { %1003 = vsyncadd (%p1389_p7), %s230_s29, 4294966784  ;;  %s639_s5 = sshll.u32 %s229_s11, 9  ;;  %s239_s10 = scalar_lea.sflag [#allocation6], %s229_s11 }
  0x4f   : > { %s1223_s28 = scalar_lea.vmem [#allocation5], %s639_s5 }
  0x50   : > { %1005 = dma.done.wait (%p1389_p7), %s239_s10, 8192  }
  0x51   : > { %1007 = vsyncadd (%p1389_p7), %s239_s10, 4294959104  ;;  %p640_p9 = scmp.ne.s32.totalorder %s1030_s18, 0 }
  0x52   : > { %v1044_v0 = vmov (!%p640_p9), 0.0  }
  0x53   : > { %272 = sbr.rel (%p640_p9) target bundleno = 90 (0x5a), region = 44  ;;  %273 = vst [vmem:[#allocation7] sm:$0xff] (!%p640_p9), %v1044_v0 }
  0x5a PF: > { %v295_v1 = vld [vmem:[%s1223_s28 + $0x80] sm:$0xff]  ;;  %v296_v2 = vld [vmem:[%s1223_s28 + $0x88] sm:$0xff]  ;;  %v297_v12 = vld [vmem:[%s1223_s28 + $0x90] sm:$0xff]  ;;  %p641_p13 = scmp.ne.s32.totalorder %s1030_s18, 1 }
  0x5b   : > { %v327_v3 = vld [vmem:[%s1223_s28 + $0x180] sm:$0xff]  ;;  %v721_v4 = vpack.c.bf16 %v296_v2, %v295_v1  ;;  %v328_v5 = vld [vmem:[%s1223_s28 + $0x188] sm:$0xff]  ;;  %v298_v14 = vld [vmem:[%s1223_s28 + $0x98] sm:$0xff] }
  0x5c   : > { %v279_v6 = vld [vmem:[%s1223_s28] sm:$0xff]  ;;  %v280_v7 = vld [vmem:[%s1223_s28 + $0x8] sm:$0xff]  ;;  %v753_v8 = vpack.c.bf16 %v328_v5, %v327_v3  ;;  %v329_v15 = vld [vmem:[%s1223_s28 + $0x190] sm:$0xff]  ;;  %v725_v17 = vpack.c.bf16 %v298_v14, %v297_v12 }
  0x5d   : > { %v723_v9 = vpack.c.bf16 %v280_v7, %v279_v6  ;;  %v311_v10 = vld [vmem:[%s1223_s28 + $0x100] sm:$0xff]  ;;  %v312_v11 = vld [vmem:[%s1223_s28 + $0x108] sm:$0xff]  ;;  %722 = vmatprep.subr.bf16.mxu0 %v721_v4  ;;  %v330_v16 = vld [vmem:[%s1223_s28 + $0x198] sm:$0xff] }
  0x5e   : > { %v755_v13 = vpack.c.bf16 %v312_v11, %v311_v10  ;;  %754 = vmatprep.subr.bf16.mxu1 %v753_v8  ;;  %v757_v18 = vpack.c.bf16 %v330_v16, %v329_v15  ;;  %v281_v19 = vld [vmem:[%s1223_s28 + $0x10] sm:$0xff]  ;;  %v282_v20 = vld [vmem:[%s1223_s28 + $0x18] sm:$0xff]  ;;  %v299_v24 = vld [vmem:[%s1223_s28 + $0xa0] sm:$0xff] }
  0x5f   : > { %724 = vmatpush3.bf16.msra.mxu0 %v723_v9  ;;  %v313_v21 = vld [vmem:[%s1223_s28 + $0x110] sm:$0xff]  ;;  %v727_v22 = vpack.c.bf16 %v282_v20, %v281_v19  ;;  %v314_v23 = vld [vmem:[%s1223_s28 + $0x118] sm:$0xff]  ;;  %v300_v25 = vld [vmem:[%s1223_s28 + $0xa8] sm:$0xff] }
  0x60   : > { %756 = vmatpush3.bf16.msra.mxu1 %v755_v13  ;;  %726 = vmatprep.subr.bf16.mxu0 %v725_v17  ;;  %v759_v26 = vpack.c.bf16 %v314_v23, %v313_v21  ;;  %v729_v27 = vpack.c.bf16 %v300_v25, %v299_v24  ;;  %v331_v28 = vld [vmem:[%s1223_s28 + $0x1a0] sm:$0xff]  ;;  %v332_v29 = vld [vmem:[%s1223_s28 + $0x1a8] sm:$0xff]  ;;  %v301_v36 = vld [vmem:[%s1223_s28 + $0xb0] sm:$0xff] }
  0x61   : > { %758 = vmatprep.subr.bf16.mxu1 %v757_v18  ;;  %v283_v30 = vld [vmem:[%s1223_s28 + $0x20] sm:$0xff]  ;;  %v761_v31 = vpack.c.bf16 %v332_v29, %v331_v28  ;;  %v284_v32 = vld [vmem:[%s1223_s28 + $0x28] sm:$0xff]  ;;  %v302_v37 = vld [vmem:[%s1223_s28 + $0xb8] sm:$0xff] }
  0x62   : > { %v315_v33 = vld [vmem:[%s1223_s28 + $0x120] sm:$0xff]  ;;  %v316_v34 = vld [vmem:[%s1223_s28 + $0x128] sm:$0xff]  ;;  %v731_v35 = vpack.c.bf16 %v284_v32, %v283_v30  ;;  %v333_v38 = vld [vmem:[%s1223_s28 + $0x1b0] sm:$0xff]  ;;  %v733_v40 = vpack.c.bf16 %v302_v37, %v301_v36 }
  0x63   : > { %728 = vmatpush3.bf16.msra.mxu0 %v727_v22  ;;  %v763_v39 = vpack.c.bf16 %v316_v34, %v315_v33  ;;  %v334_v41 = vld [vmem:[%s1223_s28 + $0x1b8] sm:$0xff]  ;;  %v285_v42 = vld [vmem:[%s1223_s28 + $0x30] sm:$0xff]  ;;  %v303_v47 = vld [vmem:[%s1223_s28 + $0xc0] sm:$0xff] }
  0x64   : > { %760 = vmatpush3.bf16.msra.mxu1 %v759_v26  ;;  %730 = vmatprep.subr.bf16.mxu0 %v729_v27  ;;  %v286_v43 = vld [vmem:[%s1223_s28 + $0x38] sm:$0xff]  ;;  %v765_v44 = vpack.c.bf16 %v334_v41, %v333_v38  ;;  %v317_v45 = vld [vmem:[%s1223_s28 + $0x130] sm:$0xff]  ;;  %v304_v48 = vld [vmem:[%s1223_s28 + $0xc8] sm:$0xff] }
  0x65   : > { %762 = vmatprep.subr.bf16.mxu1 %v761_v31  ;;  %v318_v46 = vld [vmem:[%s1223_s28 + $0x138] sm:$0xff]  ;;  %v335_v49 = vld [vmem:[%s1223_s28 + $0x1c0] sm:$0xff]  ;;  %v336_v50 = vld [vmem:[%s1223_s28 + $0x1c8] sm:$0xff]  ;;  %v735_v51 = vpack.c.bf16 %v286_v43, %v285_v42  ;;  %v737_v53 = vpack.c.bf16 %v304_v48, %v303_v47 }
  0x66   : > { %v767_v52 = vpack.c.bf16 %v318_v46, %v317_v45  ;;  %v287_v54 = vld [vmem:[%s1223_s28 + $0x40] sm:$0xff]  ;;  %v288_v55 = vld [vmem:[%s1223_s28 + $0x48] sm:$0xff]  ;;  %v769_v57 = vpack.c.bf16 %v336_v50, %v335_v49  ;;  %v305_v59 = vld [vmem:[%s1223_s28 + $0xd0] sm:$0xff] }
  0x67   : > { %732 = vmatpush3.bf16.msra.mxu0 %v731_v35  ;;  %v319_v56 = vld [vmem:[%s1223_s28 + $0x140] sm:$0xff]  ;;  %v320_v58 = vld [vmem:[%s1223_s28 + $0x148] sm:$0xff]  ;;  %v306_v60 = vld [vmem:[%s1223_s28 + $0xd8] sm:$0xff]  ;;  %v739_v63 = vpack.c.bf16 %v288_v55, %v287_v54 }
  0x68   : > { %764 = vmatpush3.bf16.msra.mxu1 %v763_v39  ;;  %734 = vmatprep.subr.bf16.mxu0 %v733_v40  ;;  %v337_v61 = vld [vmem:[%s1223_s28 + $0x1d0] sm:$0xff]  ;;  %v338_v62 = vld [vmem:[%s1223_s28 + $0x1d8] sm:$0xff]  ;;  %v771_v0 = vpack.c.bf16 %v320_v58, %v319_v56  ;;  %v741_v1 = vpack.c.bf16 %v306_v60, %v305_v59  ;;  %v307_v7 = vld [vmem:[%s1223_s28 + $0xe0] sm:$0xff] }
  0x69   : > { %766 = vmatprep.subr.bf16.mxu1 %v765_v44  ;;  %v289_v2 = vld [vmem:[%s1223_s28 + $0x50] sm:$0xff]  ;;  %v290_v3 = vld [vmem:[%s1223_s28 + $0x58] sm:$0xff]  ;;  %v773_v5 = vpack.c.bf16 %v338_v62, %v337_v61  ;;  %v308_v8 = vld [vmem:[%s1223_s28 + $0xe8] sm:$0xff] }
  0x6a   : > { %v321_v4 = vld [vmem:[%s1223_s28 + $0x150] sm:$0xff]  ;;  %v322_v6 = vld [vmem:[%s1223_s28 + $0x158] sm:$0xff]  ;;  %v339_v9 = vld [vmem:[%s1223_s28 + $0x1e0] sm:$0xff]  ;;  %v743_v11 = vpack.c.bf16 %v290_v3, %v289_v2  ;;  %v745_v15 = vpack.c.bf16 %v308_v8, %v307_v7 }
  0x6b   : > { %736 = vmatpush3.bf16.msra.mxu0 %v735_v51  ;;  %v340_v10 = vld [vmem:[%s1223_s28 + $0x1e8] sm:$0xff]  ;;  %v291_v12 = vld [vmem:[%s1223_s28 + $0x60] sm:$0xff]  ;;  %v775_v14 = vpack.c.bf16 %v322_v6, %v321_v4  ;;  %v278_v18 = vld [vmem:[%s1217_s30 + $0x18] sm:$0xff] }
  0x6c   : > { %768 = vmatpush3.bf16.msra.mxu1 %v767_v52  ;;  %738 = vmatprep.subr.bf16.mxu0 %v737_v53  ;;  %v292_v13 = vld [vmem:[%s1223_s28 + $0x68] sm:$0xff]  ;;  %v323_v16 = vld [vmem:[%s1223_s28 + $0x160] sm:$0xff]  ;;  %v777_v19 = vpack.c.bf16 %v340_v10, %v339_v9  ;;  %v309_v21 = vld [vmem:[%s1223_s28 + $0xf0] sm:$0xff] }
  0x6d   : > { %770 = vmatprep.subr.bf16.mxu1 %v769_v57  ;;  %v276_v17 = vld [vmem:[%s1217_s30 + $0x8] sm:$0xff]  ;;  %v310_v22 = vld [vmem:[%s1223_s28 + $0xf8] sm:$0xff]  ;;  %v341_v23 = vld [vmem:[%s1223_s28 + $0x1f0] sm:$0xff]  ;;  %477 = vmatprep.mubr.f32.mxu1 %v278_v18  ;;  %v747_v25 = vpack.c.bf16 %v292_v13, %v291_v12 }
  0x6e   : > { %v324_v20 = vld [vmem:[%s1223_s28 + $0x168] sm:$0xff]  ;;  %407 = vmatprep.mubr.f32.mxu0 %v276_v17  ;;  %v342_v24 = vld [vmem:[%s1223_s28 + $0x1f8] sm:$0xff]  ;;  %v749_v27 = vpack.c.bf16 %v310_v22, %v309_v21  ;;  %v293_v28 = vld [vmem:[%s1223_s28 + $0x70] sm:$0xff] }
  0x6f   : > { %740 = vmatpush3.bf16.msra.mxu0 %v739_v63  ;;  %v779_v26 = vpack.c.bf16 %v324_v20, %v323_v16  ;;  %v294_v29 = vld [vmem:[%s1223_s28 + $0x78] sm:$0xff]  ;;  %v781_v30 = vpack.c.bf16 %v342_v24, %v341_v23  ;;  %v325_v31 = vld [vmem:[%s1223_s28 + $0x170] sm:$0xff]  ;;  %v275_v35 = vld [vmem:[%s1217_s30] sm:$0xff] }
  0x70   : > { %772 = vmatpush3.bf16.msra.mxu1 %v771_v0  ;;  %742 = vmatprep.subr.bf16.mxu0 %v741_v1  ;;  %v326_v32 = vld [vmem:[%s1223_s28 + $0x178] sm:$0xff]  ;;  %v751_v33 = vpack.c.bf16 %v294_v29, %v293_v28  ;;  %v277_v36 = vld [vmem:[%s1217_s30 + $0x10] sm:$0xff]  ;;  %v274_v43 = vld [vmem:[#allocation7] sm:$0xff] }
  0x71   : > { %774 = vmatprep.subr.bf16.mxu1 %v773_v5  ;;  %v783_v34 = vpack.c.bf16 %v326_v32, %v325_v31  ;;  %v642_v47 = vld [vmem:[%s1379_s2] ss:$0 sm:$0xff] (!%p641_p13) }
  0x73   : > { %744 = vmatpush3.bf16.msra.mxu0 %v743_v11 }
  0x74   : > { %776 = vmatpush3.bf16.msra.mxu1 %v775_v14  ;;  %746 = vmatprep.subr.bf16.mxu0 %v745_v15 }
  0x75   : > { %778 = vmatprep.subr.bf16.mxu1 %v777_v19 }
  0x77   : > { %748 = vmatpush3.bf16.msra.mxu0 %v747_v25 }
  0x78   : > { %780 = vmatpush3.bf16.msra.mxu1 %v779_v26  ;;  %750 = vmatprep.subr.bf16.mxu0 %v749_v27 }
  0x79   : > { %782 = vmatprep.subr.bf16.mxu1 %v781_v30 }
  0x7b   : > { %752 = vmatpush3.bf16.msra.mxu0 %v751_v33 }
  0x7c   : > { %784 = vmatpush3.bf16.msra.mxu1 %v783_v34 }
  0x7e   : > { %408 = vmatmul.mubr.f32.vlgmr.msra.gmra.mrb[0].mxu0 %v275_v35 }
  0x7f   : > { %478 = vmatmul.mubr.f32.vlgmr.msra.gmra.mrb[0].mxu1 %v277_v36 }
 0x151   : > { %v683_v37 = vpop.f32.mrb[0].mxu0 }
 0x152   : > { %v718_v38 = vpop.f32.mrb[0].mxu1  ;;  %v684_v39 = vpop.f32.mrb[1].mxu0 }
 0x153   : > { %v685_v40 = vadd.f32 %v684_v39, %v683_v37  ;;  %v719_v41 = vpop.f32.mrb[1].mxu1 }
 0x154   : > { %v720_v42 = vadd.f32 %v719_v41, %v718_v38  ;;  %488 = sbr.rel (%p641_p13) target bundleno = 516 (0x204), region = 48 }
 0x156   : > { %v480_v44 = vadd.f32 %v720_v42, %v685_v40 }
 0x158   : > { %v483_v45 = vadd.f32 %v480_v44, %v274_v43 }
 0x15a   : > { %484 = vst [vmem:[#allocation7] sm:$0xff] %v483_v45 }
 0x161   : > { %v489_v46 = vld [vmem:[#allocation7] sm:$0xff] }
 0x162   : > { %v497_v48 = vadd.f32 %v642_v47, %v489_v46 }
 0x164   : > { %498 = vst [vmem:[#allocation7] sm:$0xff] %v497_v48  ;;  %v499_v49 = vmul.f32 %v497_v48, %v497_v48 }
 0x166   : > { %500 = vadd.xlane.f32.xlu0 %v499_v49 }
 0x1f3   : > { %v501_v50 = vpop.xlane.xlu0 %500 }
 0x1f4   : > { %v502_v51 = vmax.f32 %v501_v50, 1e-24 }
 0x1f6   : > { %862 = vrsqrt.f32 %v502_v51 }
 0x200   : > { %v863_v52 = vpop.eup %862 }
 0x201   : > { %v504_v53 = vmul.f32 %v863_v52, %v497_v48 }
 0x203   : > { %505 = vst [vmem:[#allocation8] sm:$0xff] %v504_v53 }
 0x204 PF: > { %p1304_p6 = scmp.eq.s32.totalorder %s628_s21, 1  ;;  %s1045_s15 = smov [#allocation7]  }
 0x205   : > { %s515_s24 = sshll.u32 %s1045_s15, 4  ;;  %s1046_s7 = smov [#allocation8]   ;;  %s516_s24 = int_to_ptr.vmem [resolvable:$true] %s515_s24 }
 0x206   : > { %s528_s8 = sshll.u32 %s1046_s7, 4  ;;  %s924_s12 = scalar_lea.vmem %s516_s24, 128  ;;  %s1308_s8 = int_to_ptr.vmem [resolvable:$true] %s528_s8 }
 0x207   : > { %p925_p8 = scmp.ne.s32.totalorder %s516_s24, %s924_s12  ;;  %p931_p1 = scmp.lt.s32.totalorder %s516_s24, %s516_s24 }
 0x208   : > { %p932_p5 = scmp.lt.s32.totalorder %s924_s12, %s924_s12 }
 0x209   : > { %p926_p3 = pnand %p925_p8, %p1304_p6 }
 0x20a   : > { %p933_p10 = por %p932_p5, %p931_p1 }
 0x20b   : > { %p927_p4 = pneg %p926_p3 }
 0x20d   : > { %p934_p11 = pnand %p933_p10, %p927_p4 }
 0x20f   : > { %937 = shalt.err (!%p934_p11)
}
 0x210   : > { %s938_s14 = scalar_lea.hbm %s1380_s3, 128 }
 0x211   : > { %p939_p12 = scmp.ne.s32.totalorder %s1380_s3, %s938_s14  ;;  %p944_p7 = scmp.lt.u32.totalorder %s938_s14, %s1380_s3 }
 0x213   : > { %p940_p0 = pnand %p939_p12, %p1304_p6 }
 0x215   : > { %p941_p2 = pneg %p940_p0 }
 0x217   : > { %p946_p9 = pnand %p944_p7, %p941_p2 }
 0x219   : > { %949 = shalt.err (!%p946_p9)
}
 0x21a   : > { %790 = dma.vmem_to_hbm [thread:$0]  (%p1304_p6), %s516_s24, 128, %s1380_s3, [#allocation4]  }
 0x21b   : > { %s950_s5 = scalar_lea.vmem %s1308_s8, 128  ;;  %p957_p4 = scmp.lt.s32.totalorder %s1308_s8, %s1308_s8 }
 0x21c   : > { %p951_p13 = scmp.ne.s32.totalorder %s1308_s8, %s950_s5  ;;  %p958_p1 = scmp.lt.s32.totalorder %s950_s5, %s950_s5 }
 0x21e   : > { %p952_p8 = pnand %p951_p13, %p1304_p6  ;;  %p959_p5 = por %p958_p1, %p957_p4 }
 0x220   : > { %p953_p3 = pneg %p952_p8 }
 0x222   : > { %p960_p10 = pnand %p959_p5, %p953_p3 }
 0x224   : > { %963 = shalt.err (!%p960_p10)
}
 0x225   : > { %s964_s26 = scalar_lea.hbm %s1381_s4, 128 }
 0x226   : > { %p965_p11 = scmp.ne.s32.totalorder %s1381_s4, %s964_s26  ;;  %p970_p2 = scmp.lt.u32.totalorder %s964_s26, %s1381_s4 }
 0x228   : > { %p966_p12 = pnand %p965_p11, %p1304_p6 }
 0x22a   : > { %p967_p0 = pneg %p966_p12 }
 0x22c   : > { %p972_p7 = pnand %p970_p2, %p967_p0 }
 0x22e   : > { %975 = shalt.err (!%p972_p7)
}
 0x22f   : > { %792 = dma.vmem_to_hbm [thread:$0]  (%p1304_p6), %s1308_s8, 128, %s1381_s4, [#allocation9]  }
 0x230   : > { %1009 = dma.done.wait (%p1304_p6), [#allocation4], 128  }
 0x231   : > { %1011 = vsyncadd (%p1304_p6), [#allocation4], 4294967168 }
 0x232   : > { %1013 = dma.done.wait (%p1304_p6), [#allocation9], 128  }
 0x233   : > { %1015 = vsyncadd (%p1304_p6), [#allocation9], 4294967168 }
 0x234 PF: > { %s23_s20 = sadd.s32 1, %s1038_s20   ;;  %s1391_s15 = smov %s1022_s16 }
 0x235   : > { %p20_p9 = scmp.ge.s32.totalorder %s23_s20, 4   ;;  %s1392_s16 = smov %s1026_s17 }
 0x236   : > { %s1393_s17 = smov %s1123_s27  ;;  %s1394_s18 = smov %s1034_s19 }
 0x237   : > { %s1395_s19 = smov %s1397_s22  ;;  %22 = sbr.rel (!%p20_p9) target bundleno = 8 (0x8), region = 100 }
 0x23e   :  { %545 = vsyncpa [#allocation3], 1 }
 0x23f   :  { %547 = vsyncpa [#allocation3 + $0x1], 1 }
 0x240   :  { %548 = vsyncpa [#allocation6], 1 }
 0x241   :  { %550 = vsyncpa [#allocation6 + $0x1], 1 }
 0x242   :  { %551 = vsyncpa [#allocation4], 1 }
 0x243   :  { %553 = vsyncpa [#allocation4 + $0x1], 1 }
 0x244   :  { %554 = vsyncpa [#allocation9], 1 }

</bundles_post_ra>
